<compile_context>
chip_gen: v6e
topology: v6e:2x2x1
jax: 0.10.0
libtpu: 0.0.40
codegen_flags: <defaults>
</compile_context>

<pallas_src>
import functools

import numpy as np
import jax
import jax.numpy as jnp
from jax.experimental import pallas as pl
from jax.experimental.pallas import tpu as pltpu

TH_CONF = 0.5
TH_IOU = 0.5
VAR_CENTER = 0.1   # SSD center variance
VAR_SIZE = 0.2     # SSD size variance


# --------------------------------------------------------------------------
# Kernel 1: softmax over classes + SSD anchor decode, anchor-tiled.
# --------------------------------------------------------------------------
def _decode_softmax_kernel(conf_ref, loc_ref, anc_ref, score_ref, slab_ref):
    # conf_ref: (1, TA, C)  loc_ref: (1, TA, 4)  anc_ref: (4, TA) rows=(cx,cy,w,h)
    conf_t = conf_ref[0].astype(jnp.float32).T            # (C, TA) XLU transpose
    m = jnp.max(conf_t, axis=0, keepdims=True)            # (1, TA) sublane reduce
    e = jnp.exp(conf_t - m)
    denom = jnp.sum(e, axis=0, keepdims=True)             # (1, TA)
    score = e / denom                                      # exact divide (parity)
    score_ref[0] = score.astype(score_ref.dtype)           # bf16 lane-dense store

    lt = loc_ref[0].astype(jnp.float32).T                  # (4, TA)
    at = anc_ref[...].astype(jnp.float32)                  # (4, TA)
    a_cx, a_cy, a_w, a_h = at[0:1], at[1:2], at[2:3], at[3:4]
    # TODO(synk): anchor.decode() implementation is not in the spec; mirror the
    # standard SSD decode (center/size variances 0.1 / 0.2).
    cx = a_cx + lt[0:1] * VAR_CENTER * a_w
    cy = a_cy + lt[1:2] * VAR_CENTER * a_h
    w = a_w * jnp.exp(lt[2:3] * VAR_SIZE)
    h = a_h * jnp.exp(lt[3:4] * VAR_SIZE)
    xmin, ymin = cx - 0.5 * w, cy - 0.5 * h
    xmax, ymax = cx + 0.5 * w, cy + 0.5 * h
    area = w * h
    zeros = jnp.zeros_like(xmin)
    slab = jnp.concatenate([xmin, ymin, xmax, ymax, area, zeros, zeros, zeros],
                           axis=0)                          # (8, TA)
    slab_ref[0] = slab.astype(slab_ref.dtype)


# --------------------------------------------------------------------------
# Kernel 2: tiled pairwise suppression mask (inter > th_iou * union), int8 out.
# --------------------------------------------------------------------------
def _iou_mask_kernel(th_iou, compute_dtype, bi_ref, bj_ref, mask_ref, bit_ref):
    # bi_ref: (1, 8, TI), bj_ref: (1, 8, TJ); rows = (xmin, ymin, xmax, ymax, area, 0,0,0)
    # bit_ref: VMEM scratch (TI, 8) -- transposed i-slab, hoisted out of the j loop.
    @pl.when(pl.program_id(2) == 0)
    def _():
        bit_ref[...] = bi_ref[0].T.astype(compute_dtype)    # one XLU transpose / i-tile

    bit = bit_ref[...]                                       # (TI, 8)
    xmin_i, ymin_i = bit[:, 0:1], bit[:, 1:2]
    xmax_i, ymax_i = bit[:, 2:3], bit[:, 3:4]
    area_i = bit[:, 4:5]

    bj = bj_ref[0].astype(compute_dtype)                     # (8, TJ)
    xmin_j, ymin_j = bj[0:1, :], bj[1:2, :]
    xmax_j, ymax_j = bj[2:3, :], bj[3:4, :]
    area_j = bj[4:5, :]

    zero = jnp.array(0.0, compute_dtype)
    iw = jnp.maximum(jnp.minimum(xmax_i, xmax_j) - jnp.maximum(xmin_i, xmin_j), zero)
    ih = jnp.maximum(jnp.minimum(ymax_i, ymax_j) - jnp.maximum(ymin_i, ymin_j), zero)
    inter = iw * ih                                           # (TI, TJ)
    union = area_i + area_j - inter                           # > 0 for real anchors
    sup = inter > (jnp.array(th_iou, compute_dtype) * union)  # divide-free threshold
    mask_ref[0] = sup.astype(mask_ref.dtype)                  # int8 lane-dense store


# --------------------------------------------------------------------------
# Wrapper-side helpers.
# --------------------------------------------------------------------------
def _iou_compute_dtype():
    """bf16 VALU math only on chips that have a bf16 VPU (v6e / v7x)."""
    try:
        kind = jax.devices()[0].device_kind.lower()
    except Exception:
        kind = ""
    return jnp.bfloat16 if ("v6" in kind or "v7" in kind) else jnp.float32


def _pad_target(A):
    if A >= 1024:
        return 1024
    if A >= 512:
        return 512
    return 128


def _pick_tile(A_pad, candidates):
    for t in candidates:
        if A_pad % t == 0:
            return t
    return 128  # unreachable: A_pad is always a multiple of 128


def detect_postprocess_core(conf, loc, anchor, th_iou=TH_IOU):
    """Pallas part: bf16 scores (B,C,Ap), f32 box slab (B,8,Ap), int8 suppression
    mask (B,Ap,Ap) with sup[a,b] = (IoU(a,b) > th_iou), plus the anchor validity
    mask (Ap,) for the padded tail."""
    B, A, C = conf.shape

    # Pad the anchor axis to a tile multiple (keeps stores unmasked, avoids the
    # old full-extent fallback that cannot fit VMEM for realistic A).
    tgt = _pad_target(A)
    A_pad = -(-A // tgt) * tgt
    pad = A_pad - A
    if pad:
        conf = jnp.pad(conf, ((0, 0), (0, pad), (0, 0)))
        loc = jnp.pad(loc, ((0, 0), (0, pad), (0, 0)))
        anchor = jnp.pad(anchor, ((0, pad), (0, 0)))
    valid_mask = jnp.arange(A_pad) < A

    anchor_t = anchor.T.astype(jnp.float32)                  # (4, A_pad), tiny

    # --- kernel 1: softmax + decode, anchor-tiled, lane-dense outputs ---
    ta = _pick_tile(A_pad, (4096, 2048, 1024, 512, 256, 128))
    n_a = A_pad // ta
    bytes1 = (B * A_pad * C * 4 + B * A_pad * 4 * 4 + 4 * A_pad * 4
              + B * C * A_pad * 2 + B * 8 * A_pad * 4)
    score_t, boxslab = pl.pallas_call(
        _decode_softmax_kernel,
        out_shape=(
            jax.ShapeDtypeStruct((B, C, A_pad), jnp.bfloat16),
            jax.ShapeDtypeStruct((B, 8, A_pad), jnp.float32),
        ),
        grid_spec=pltpu.PrefetchScalarGridSpec(
            num_scalar_prefetch=0,
            grid=(B, n_a),
            in_specs=[
                pl.BlockSpec((1, ta, C), lambda b, a: (b, a, 0)),
                pl.BlockSpec((1, ta, 4), lambda b, a: (b, a, 0)),
                pl.BlockSpec((4, ta), lambda b, a: (0, a)),
            ],
            out_specs=[
                pl.BlockSpec((1, C, ta), lambda b, a: (b, 0, a)),
                pl.BlockSpec((1, 8, ta), lambda b, a: (b, 0, a)),
            ],
        ),
        compiler_params=pltpu.CompilerParams(
            dimension_semantics=("parallel", "parallel"),
            vmem_limit_bytes=32 * 1024 * 1024),
        cost_estimate=pl.CostEstimate(
            flops=int(B * A_pad * (3 * C + 25)),
            transcendentals=int(B * A_pad * (C + 2)),
            bytes_accessed=int(bytes1)),
    )(conf, loc, anchor_t)

    # --- kernel 2: tiled pairwise suppression mask, int8 output ---
    ti = tj = _pick_tile(A_pad, (1024, 512, 256, 128))
    n_i, n_j = A_pad // ti, A_pad // tj
    compute_dtype = _iou_compute_dtype()
    bytes2 = B * A_pad * A_pad * 1 + B * n_i * n_j * 8 * (ti + tj) * 4
    sup = pl.pallas_call(
        functools.partial(_iou_mask_kernel, float(th_iou), compute_dtype),
        out_shape=jax.ShapeDtypeStruct((B, A_pad, A_pad), jnp.int8),
        grid_spec=pltpu.PrefetchScalarGridSpec(
            num_scalar_prefetch=0,
            grid=(B, n_i, n_j),
            in_specs=[
                pl.BlockSpec((1, 8, ti), lambda b, i, j: (b, 0, i)),
                pl.BlockSpec((1, 8, tj), lambda b, i, j: (b, 0, j)),
            ],
            out_specs=pl.BlockSpec((1, ti, tj), lambda b, i, j: (b, i, j)),
            scratch_shapes=[pltpu.VMEM((ti, 8), compute_dtype)],
        ),
        compiler_params=pltpu.CompilerParams(
            dimension_semantics=("parallel", "parallel", "arbitrary"),
            vmem_limit_bytes=48 * 1024 * 1024),
        cost_estimate=pl.CostEstimate(
            flops=int(B * A_pad * A_pad * 11),
            transcendentals=0,
            bytes_accessed=int(bytes2)),
    )(boxslab, boxslab)

    return score_t, boxslab, sup, valid_mask


# --------------------------------------------------------------------------
# Greedy NMS consuming the in-kernel suppression mask (no A^2 permuted gather).
# --------------------------------------------------------------------------
def _greedy_nms_keep(scores_1d, sup, valid_mask, th_conf):
    """Greedy NMS. scores_1d: (Ap,), sup: (Ap, Ap) int8 (IoU > th_iou),
    valid_mask: (Ap,) bool. Returns keep mask in original anchor order."""
    Ap = scores_1d.shape[0]
    scores_f = scores_1d.astype(jnp.float32)
    valid = (scores_f >= th_conf) & valid_mask
    order = jnp.argsort(-jnp.where(valid, scores_f, -jnp.inf))     # descending
    rank = jnp.zeros((Ap,), jnp.int32).at[order].set(
        jnp.arange(Ap, dtype=jnp.int32))

    def body(i, keep):
        bi = order[i]
        active = keep[bi]
        row = sup[bi] != 0                      # one row, original order
        suppress = row & (rank > i) & active    # only lower-ranked boxes
        return keep & (~suppress)

    return jax.lax.fori_loop(0, Ap, body, valid)


# jit + vmap over (batch, class): one device dispatch for the whole NMS.
_nms_batched = jax.jit(
    jax.vmap(jax.vmap(_greedy_nms_keep, in_axes=(0, None, None, None)),
             in_axes=(0, 0, None, None)))


def detect_postprocess(conf, loc, anchor, th_conf=TH_CONF, th_iou=TH_IOU):
    """Full DetectPostProcess.forward equivalent (softmax logistic, has_bg=1)."""
    score_t, boxslab, sup, valid_mask = detect_postprocess_core(conf, loc, anchor, th_iou)
    B, C, A_pad = score_t.shape
    has_bg = 1  # softmax regression -> class 0 is background

    keep = _nms_batched(score_t[:, has_bg:, :], sup, valid_mask, float(th_conf))
    keep, score_f, boxslab = jax.block_until_ready(
        (keep, score_t.astype(jnp.float32), boxslab))

    keep_np = np.asarray(keep)               # (B, C-1, A_pad)
    score_np = np.asarray(score_f)           # (B, C, A_pad)
    box_np = np.asarray(boxslab)[:, :4, :]   # (B, 4, A_pad) rows = xmin,ymin,xmax,ymax

    # TODO(synk): variable-length nested list output (and optional
    # max_num_detection topk) has no fixed-shape Pallas equivalent; packaging
    # below is host-side glue over the precomputed keep masks.
    batches = []
    for b in range(B):
        classes = []
        for c in range(has_bg, C):
            kept = np.nonzero(keep_np[b, c - has_bg])[0]
            # torchvision.nms returns indices sorted by decreasing score
            kept = kept[np.argsort(-score_np[b, c, kept])]
            objs = [[float(box_np[b, 0, i]), float(box_np[b, 1, i]),
                     float(box_np[b, 2, i]), float(box_np[b, 3, i]),
                     float(score_np[b, c, i])] for i in kept]
            classes.append(objs)
        batches.append(classes)
    return batches


def _make_anchors(A):
    """Deterministic synthetic prior boxes (cx, cy, w, h) on a 16x(A//16) grid."""
    gx = 16
    gy = max(A // gx, 1)
    ii = np.arange(A)
    cx = ((ii % gx) + 0.5) / gx
    cy = ((ii // gx) + 0.5) / gy
    w = np.full((A,), 0.2)
    h = np.full((A,), 0.25)
    return jnp.asarray(np.stack([cx, cy, w, h], axis=1), dtype=jnp.float32)


if __name__ == "__main__":
    B, A, C = 2, 256, 8   # batch, anchors, classes (incl. background)
    key = jax.random.PRNGKey(0)
    k1, k2 = jax.random.split(key)
    conf = jax.random.normal(k1, (B, A, C), dtype=jnp.float32) * 2.0
    loc = jax.random.normal(k2, (B, A, 4), dtype=jnp.float32) * 0.5
    anchor = _make_anchors(A)

    # Run the Pallas kernels and block on their outputs.
    score_t, boxslab, sup, valid_mask = detect_postprocess_core(conf, loc, anchor)
    jax.block_until_ready((score_t, boxslab, sup, valid_mask))
    assert score_t.shape == (B, C, A) and boxslab.shape == (B, 8, A)
    assert sup.shape == (B, A, A)

    # Full post-process (kernel outputs -> nested detection lists).
    detections = detect_postprocess(conf, loc, anchor)
    assert len(detections) == B and len(detections[0]) == C - 1

    print("KERNEL_OK")
</pallas_src>

<mosaic_0001>
module attributes {stable_mosaic.version = 11 : i64} {
  func.func @_decode_softmax_kernel(%arg0: i32, %arg1: i32, %arg2: memref<1x256x8xf32, #tpu.memory_space<vmem>>, %arg3: memref<1x256x4xf32, #tpu.memory_space<vmem>>, %arg4: memref<4x256xf32, #tpu.memory_space<vmem>>, %arg5: memref<1x8x256xbf16, #tpu.memory_space<vmem>>, %arg6: memref<1x8x256xf32, #tpu.memory_space<vmem>>) attributes {dimension_semantics = [#tpu.dimension_semantics<parallel>, #tpu.dimension_semantics<parallel>], iteration_bounds = array<i64: 2, 1>, scalar_prefetch = 0 : i64, scratch_operands = 0 : i64, tpu.core_type = #tpu.core_type<tc>, window_params = [{transform_indices = @transform_0, window_bounds = array<i64: 1, 256, 8>}, {transform_indices = @transform_1, window_bounds = array<i64: 1, 256, 4>}, {transform_indices = @transform_2, window_bounds = array<i64: 4, 256>}, {transform_indices = @transform_3, window_bounds = array<i64: 1, 8, 256>}, {transform_indices = @transform_4, window_bounds = array<i64: 1, 8, 256>}]} {
    %c0 = arith.constant 0 : index
    %c0_0 = arith.constant 0 : index
    %c0_1 = arith.constant 0 : index
    %0 = vector.load %arg2[%c0, %c0_0, %c0_1] : memref<1x256x8xf32, #tpu.memory_space<vmem>>, vector<1x256x8xf32>
    %1 = vector.shape_cast %0 : vector<1x256x8xf32> to vector<256x8xf32>
    %2 = tpu.transpose %1, [1, 0] : vector<256x8xf32> -> vector<8x256xf32>
    %cst = arith.constant dense<0xFF800000> : vector<256xf32>
    %3 = vector.multi_reduction <maximumf>, %2, %cst [0] : vector<8x256xf32> to vector<256xf32>
    %4 = vector.shape_cast %3 : vector<256xf32> to vector<1x256xf32>
    %5 = vector.broadcast %4 : vector<1x256xf32> to vector<8x256xf32>
    %6 = arith.subf %2, %5 : vector<8x256xf32>
    %7 = math.exp %6 : vector<8x256xf32>
    %cst_2 = arith.constant dense<0.000000e+00> : vector<256xf32>
    %8 = vector.multi_reduction <add>, %7, %cst_2 [0] : vector<8x256xf32> to vector<256xf32>
    %9 = vector.shape_cast %8 : vector<256xf32> to vector<1x256xf32>
    %10 = vector.broadcast %9 : vector<1x256xf32> to vector<8x256xf32>
    %11 = arith.divf %7, %10 : vector<8x256xf32>
    %12 = arith.truncf %11 : vector<8x256xf32> to vector<8x256xbf16>
    %c0_3 = arith.constant 0 : index
    %c0_4 = arith.constant 0 : index
    %c0_5 = arith.constant 0 : index
    %13 = vector.load %arg5[%c0_3, %c0_4, %c0_5] : memref<1x8x256xbf16, #tpu.memory_space<vmem>>, vector<1x8x256xbf16>
    %14 = vector.shape_cast %13 : vector<1x8x256xbf16> to vector<8x256xbf16>
    %15 = vector.shape_cast %12 : vector<8x256xbf16> to vector<1x8x256xbf16>
    tpu.vector_store %arg5[%c0_3, %c0_4, %c0_5], %15 {strides = array<i32>} : memref<1x8x256xbf16, #tpu.memory_space<vmem>>, vector<1x8x256xbf16>,
    %c0_6 = arith.constant 0 : index
    %c0_7 = arith.constant 0 : index
    %c0_8 = arith.constant 0 : index
    %16 = vector.load %arg3[%c0_6, %c0_7, %c0_8] : memref<1x256x4xf32, #tpu.memory_space<vmem>>, vector<1x256x4xf32>
    %17 = vector.shape_cast %16 : vector<1x256x4xf32> to vector<256x4xf32>
    %18 = tpu.transpose %17, [1, 0] : vector<256x4xf32> -> vector<4x256xf32>
    %c0_9 = arith.constant 0 : index
    %c0_10 = arith.constant 0 : index
    %19 = vector.load %arg4[%c0_9, %c0_10] : memref<4x256xf32, #tpu.memory_space<vmem>>, vector<4x256xf32>
    %20 = vector.extract_strided_slice %19 {offsets = [0, 0], sizes = [1, 256], strides = [1, 1]} : vector<4x256xf32> to vector<1x256xf32>
    %21 = vector.extract_strided_slice %19 {offsets = [1, 0], sizes = [1, 256], strides = [1, 1]} : vector<4x256xf32> to vector<1x256xf32>
    %22 = vector.extract_strided_slice %19 {offsets = [2, 0], sizes = [1, 256], strides = [1, 1]} : vector<4x256xf32> to vector<1x256xf32>
    %23 = vector.extract_strided_slice %19 {offsets = [3, 0], sizes = [1, 256], strides = [1, 1]} : vector<4x256xf32> to vector<1x256xf32>
    %24 = vector.extract_strided_slice %18 {offsets = [0, 0], sizes = [1, 256], strides = [1, 1]} : vector<4x256xf32> to vector<1x256xf32>
    %cst_11 = arith.constant 1.000000e-01 : f32
    %25 = vector.broadcast %cst_11 : f32 to vector<1x256xf32>
    %26 = arith.mulf %24, %25 : vector<1x256xf32>
    %27 = arith.mulf %26, %22 : vector<1x256xf32>
    %28 = arith.addf %20, %27 : vector<1x256xf32>
    %29 = vector.extract_strided_slice %18 {offsets = [1, 0], sizes = [1, 256], strides = [1, 1]} : vector<4x256xf32> to vector<1x256xf32>
    %cst_12 = arith.constant 1.000000e-01 : f32
    %30 = vector.broadcast %cst_12 : f32 to vector<1x256xf32>
    %31 = arith.mulf %29, %30 : vector<1x256xf32>
    %32 = arith.mulf %31, %23 : vector<1x256xf32>
    %33 = arith.addf %21, %32 : vector<1x256xf32>
    %34 = vector.extract_strided_slice %18 {offsets = [2, 0], sizes = [1, 256], strides = [1, 1]} : vector<4x256xf32> to vector<1x256xf32>
    %cst_13 = arith.constant 2.000000e-01 : f32
    %35 = vector.broadcast %cst_13 : f32 to vector<1x256xf32>
    %36 = arith.mulf %34, %35 : vector<1x256xf32>
    %37 = math.exp %36 : vector<1x256xf32>
    %38 = arith.mulf %22, %37 : vector<1x256xf32>
    %39 = vector.extract_strided_slice %18 {offsets = [3, 0], sizes = [1, 256], strides = [1, 1]} : vector<4x256xf32> to vector<1x256xf32>
    %cst_14 = arith.constant 2.000000e-01 : f32
    %40 = vector.broadcast %cst_14 : f32 to vector<1x256xf32>
    %41 = arith.mulf %39, %40 : vector<1x256xf32>
    %42 = math.exp %41 : vector<1x256xf32>
    %43 = arith.mulf %23, %42 : vector<1x256xf32>
    %cst_15 = arith.constant 5.000000e-01 : f32
    %44 = vector.broadcast %cst_15 : f32 to vector<1x256xf32>
    %45 = arith.mulf %44, %38 : vector<1x256xf32>
    %46 = arith.subf %28, %45 : vector<1x256xf32>
    %cst_16 = arith.constant 5.000000e-01 : f32
    %47 = vector.broadcast %cst_16 : f32 to vector<1x256xf32>
    %48 = arith.mulf %47, %43 : vector<1x256xf32>
    %49 = arith.subf %33, %48 : vector<1x256xf32>
    %cst_17 = arith.constant 5.000000e-01 : f32
    %50 = vector.broadcast %cst_17 : f32 to vector<1x256xf32>
    %51 = arith.mulf %50, %38 : vector<1x256xf32>
    %52 = arith.addf %28, %51 : vector<1x256xf32>
    %cst_18 = arith.constant 5.000000e-01 : f32
    %53 = vector.broadcast %cst_18 : f32 to vector<1x256xf32>
    %54 = arith.mulf %53, %43 : vector<1x256xf32>
    %55 = arith.addf %33, %54 : vector<1x256xf32>
    %56 = arith.mulf %38, %43 : vector<1x256xf32>
    %cst_19 = arith.constant 0.000000e+00 : f32
    %57 = vector.broadcast %cst_19 : f32 to vector<1x256xf32>
    %58 = tpu.concatenate %46, %49, %52, %55, %56, %57, %57, %57 in 0 : vector<1x256xf32>, vector<1x256xf32>, vector<1x256xf32>, vector<1x256xf32>, vector<1x256xf32>, vector<1x256xf32>, vector<1x256xf32>, vector<1x256xf32> -> vector<8x256xf32>
    %c0_20 = arith.constant 0 : index
    %c0_21 = arith.constant 0 : index
    %c0_22 = arith.constant 0 : index
    %59 = vector.load %arg6[%c0_20, %c0_21, %c0_22] : memref<1x8x256xf32, #tpu.memory_space<vmem>>, vector<1x8x256xf32>
    %60 = vector.shape_cast %59 : vector<1x8x256xf32> to vector<8x256xf32>
    %61 = vector.shape_cast %58 : vector<8x256xf32> to vector<1x8x256xf32>
    tpu.vector_store %arg6[%c0_20, %c0_21, %c0_22], %61 {strides = array<i32>} : memref<1x8x256xf32, #tpu.memory_space<vmem>>, vector<1x8x256xf32>,
    return
  }
  func.func @transform_0(%arg0: i32, %arg1: i32) -> (i32, i32, i32) {
    %c0_i32 = arith.constant 0 : i32
    %c0_i32_0 = arith.constant 0 : i32
    return %arg0, %arg1, %c0_i32 : i32, i32, i32
  }
  func.func @transform_1(%arg0: i32, %arg1: i32) -> (i32, i32, i32) {
    %c0_i32 = arith.constant 0 : i32
    %c0_i32_0 = arith.constant 0 : i32
    return %arg0, %arg1, %c0_i32 : i32, i32, i32
  }
  func.func @transform_2(%arg0: i32, %arg1: i32) -> (i32, i32) {
    %c0_i32 = arith.constant 0 : i32
    %c0_i32_0 = arith.constant 0 : i32
    return %c0_i32, %arg1 : i32, i32
  }
  func.func @transform_3(%arg0: i32, %arg1: i32) -> (i32, i32, i32) {
    %c0_i32 = arith.constant 0 : i32
    %c0_i32_0 = arith.constant 0 : i32
    return %arg0, %c0_i32, %arg1 : i32, i32, i32
  }
  func.func @transform_4(%arg0: i32, %arg1: i32) -> (i32, i32, i32) {
    %c0_i32 = arith.constant 0 : i32
    %c0_i32_0 = arith.constant 0 : i32
    return %arg0, %c0_i32, %arg1 : i32, i32, i32
  }
}

</mosaic_0001>

<bundles_post_ra>
// kernel: tpu_custom_call.1
= control target key start
LH: loop header
LB: loop body
LE: loop exit
PB: predicated region body
PF: predicated region fallthrough
CT: control target
= control target key end

     0   :  { %10 = vsyncpa [#allocation3], 0  ;;  %s1313_s0 = inlined_call_operand.vmem [shape: f32[2,256,8], index: 0, kind: input, shape index: {}]   ;;  %s1314_s1 = inlined_call_operand.vmem [shape: f32[2,256,4], index: 1, kind: input, shape index: {}]   ;;  %s1315_s2 = inlined_call_operand.vmem [shape: f32[4,256], index: 2, kind: input, shape index: {}]   ;;  %s1316_s3 = inlined_call_operand.hbm [shape: bf16[2,8,256], index: 3, kind: output, shape index: {0}]   ;;  %s1317_s4 = inlined_call_operand.hbm [shape: f32[2,8,256], index: 4, kind: output, shape index: {1}]  }
   0x1   :  { %12 = vsyncpa [#allocation3 + $0x1], 0 }
   0x2   :  { %13 = vsyncpa [#allocation5], 0 }
   0x3   :  { %15 = vsyncpa [#allocation5 + $0x1], 0  ;;  %s1091_s15 = smov 0   ;;  %s1093_s16 = smov 0  }
   0x4   :  { %s1095_s17 = smov 0   ;;  %s1097_s18 = smov 0  }
   0x5   :  { %s1099_s19 = smov 0   ;;  %s1101_s20 = smov 0  }
   0x6 LB: > { %s857_s21 = sadd.s32 4294967295, %s1062_s20   ;;  %s858_s22 = sadd.s32 4294967294, %s1062_s20   ;;  %s1062_s20 = sphi %s1101_s20, %s21_s20   ;;  %s1058_s19 = sphi %s1099_s19, %s1324_s19   ;;  %s1054_s18 = sphi %s1097_s18, %s1323_s18   ;;  %s1050_s17 = sphi %s1095_s17, %s1322_s17   ;;  %s1046_s16 = sphi %s1093_s16, %s1321_s16   ;;  %s1042_s15 = sphi %s1091_s15, %s1320_s15  }
   0x7   : > { %s33_s23 = sadd.s32 1, %s1058_s19  ;;  %s124_s24 = sadd.s32 1, %s1050_s17 }
   0x8   : > { %p35_p0 = scmp.ge.s32.totalorder %s33_s23, 2  ;;  %p134_p1 = scmp.ne.s32.totalorder %s1050_s17, %s1046_s16 }
   0x9   : > { %p135_p2 = scmp.eq.s32.totalorder %s857_s21, 1  ;;  %p140_p3 = scmp.ne.s32.totalorder %s1046_s16, %s1042_s15 }
   0xa   : > { %s1326_s23 = smov (%p35_p0, %s33_s23), 0  ;;  %p141_p5 = scmp.eq.s32.totalorder %s858_s22, 1 }
   0xb   : > { %p1131_p4 = por %p135_p2, %p134_p1  ;;  %s119_s26 = ssub.s32 %s1058_s19, %s1326_s23 }
   0xc   : > { %p862_p6 = scmp.ge.s32.totalorder %s1062_s20, 1  ;;  %p122_p7 = scmp.eq.s32.totalorder %s119_s26, 0 }
   0xd   : > { %p1138_p8 = por %p141_p5, %p140_p3  ;;  %p222_p9 = scmp.lt.s32.totalorder %s1062_s20, 3 }
   0xe   : > { %s1144_s28 = scalar_select %p122_p7, %s1050_s17, %s124_s24  }
   0xf   : > { %p223_p10 = pnand %p862_p6, %p222_p9 }
  0x10   : > { %p272_p11 = scmp.lt.s32.totalorder (!%p223_p10), %s1054_s18, 1  ;;  %s1230_s11 = sand.u32 (!%p223_p10), 1, %s1046_s16  }
  0x11   : > { %226 = sbr.rel (%p223_p10) target bundleno = 279 (0x117), region = 32  ;;  %s863_s12 = sshll.u32 (!%p223_p10), %s1230_s11, 3 }
  0x12   : > { %s882_s13 = sshll.u32 (!%p223_p10), %s1054_s18, 7  ;;  %s263_s14 = scalar_lea.vmem (!%p223_p10), [#allocation2], %s863_s12 }
  0x13   : > { %s697_s21 = sshll.u32 (!%p223_p10), %s263_s14, 4  ;;  %s695_s26 = scalar_lea.hbm (!%p223_p10), %s1316_s3, %s882_s13  ;;  %s698_s21 = int_to_ptr.vmem [resolvable:$true] %s697_s21 }
  0x14   : > { %s1064_s5 = smov (!%p223_p10), [#allocation2]  }
  0x15   : > { %s960_s6 = sshll.u32 (!%p223_p10), %s1064_s5, 4  ;;  %s961_s6 = int_to_ptr.vmem [resolvable:$false] %s960_s6 }
  0x16   : > { %s1148_s29 = scalar_select %p272_p11, %s1054_s18, 1 }
  0x17   : > { %p963_p1 = scmp.lt.s32.totalorder %s698_s21, %s961_s6 }
  0x18   : > { %s879_s30 = sshll.u32 %s1148_s29, 8  ;;  %s676_s29 = scalar_lea.sflag [#allocation3], %s1230_s11 }
  0x19   : > { %s1156_s7 = scalar_lea.vmem %s1313_s0, %s879_s30  ;;  %s1195_s10 = scalar_lea.vmem %s1314_s1, %s879_s30 }
  0x1a   : > { %v315_v0 = vld [vmem:[%s1156_s7 + $0x80] sm:$0xff]  ;;  %v316_v2 = vld [vmem:[%s1156_s7 + $0x88] sm:$0xff]  ;;  %v317_v4 = vld [vmem:[%s1156_s7 + $0x90] sm:$0xff]  ;;  %s956_s30 = scalar_lea.vmem %s698_s21, 128 }
  0x1b   : > { %v299_v1 = vld [vmem:[%s1156_s7] sm:$0xff]  ;;  %363 = vxpose.xlu1.b32.start [1/16] (narrow) %v315_v0, 8  ;;  %v300_v3 = vld [vmem:[%s1156_s7 + $0x8] sm:$0xff]  ;;  %v301_v5 = vld [vmem:[%s1156_s7 + $0x10] sm:$0xff]  ;;  %p957_p12 = scmp.ne.s32.totalorder %s698_s21, %s956_s30 }
  0x1c   : > { %331 = vxpose.xlu0.b32.start [1/16] (narrow) %v299_v1, 8  ;;  %v318_v6 = vld [vmem:[%s1156_s7 + $0x98] sm:$0xff]  ;;  %v319_v8 = vld [vmem:[%s1156_s7 + $0xa0] sm:$0xff]  ;;  %v320_v10 = vld [vmem:[%s1156_s7 + $0xa8] sm:$0xff] }
  0x1d   : > { %v302_v7 = vld [vmem:[%s1156_s7 + $0x18] sm:$0xff]  ;;  %v303_v9 = vld [vmem:[%s1156_s7 + $0x20] sm:$0xff]  ;;  %v304_v11 = vld [vmem:[%s1156_s7 + $0x28] sm:$0xff]  ;;  %p958_p13 = pnand %p957_p12, %p1131_p4 }
  0x1e   : > { %v321_v12 = vld [vmem:[%s1156_s7 + $0xb0] sm:$0xff]  ;;  %v322_v14 = vld [vmem:[%s1156_s7 + $0xb8] sm:$0xff]  ;;  %v323_v16 = vld [vmem:[%s1156_s7 + $0xc0] sm:$0xff] }
  0x1f   : > { %364 = vxpose.xlu1.b32.cont [2/16] (narrow) %v316_v2, 8  ;;  %v305_v13 = vld [vmem:[%s1156_s7 + $0x30] sm:$0xff]  ;;  %v306_v15 = vld [vmem:[%s1156_s7 + $0x38] sm:$0xff]  ;;  %v307_v17 = vld [vmem:[%s1156_s7 + $0x40] sm:$0xff]  ;;  %p959_p0 = pneg %p958_p13 }
  0x20   : > { %332 = vxpose.xlu0.b32.cont [2/16] (narrow) %v300_v3, 8  ;;  %v324_v18 = vld [vmem:[%s1156_s7 + $0xc8] sm:$0xff]  ;;  %v325_v20 = vld [vmem:[%s1156_s7 + $0xd0] sm:$0xff]  ;;  %v326_v22 = vld [vmem:[%s1156_s7 + $0xd8] sm:$0xff] }
  0x21   : > { %v308_v19 = vld [vmem:[%s1156_s7 + $0x48] sm:$0xff]  ;;  %v309_v21 = vld [vmem:[%s1156_s7 + $0x50] sm:$0xff]  ;;  %v310_v23 = vld [vmem:[%s1156_s7 + $0x58] sm:$0xff] }
  0x22   : > { %v327_v24 = vld [vmem:[%s1156_s7 + $0xe0] sm:$0xff]  ;;  %v328_v26 = vld [vmem:[%s1156_s7 + $0xe8] sm:$0xff]  ;;  %v329_v28 = vld [vmem:[%s1156_s7 + $0xf0] sm:$0xff] }
  0x23   : > { %365 = vxpose.xlu1.b32.cont [3/16] (narrow) %v317_v4, 8  ;;  %v311_v25 = vld [vmem:[%s1156_s7 + $0x60] sm:$0xff]  ;;  %v312_v27 = vld [vmem:[%s1156_s7 + $0x68] sm:$0xff]  ;;  %v313_v29 = vld [vmem:[%s1156_s7 + $0x70] sm:$0xff] }
  0x24   : > { %333 = vxpose.xlu0.b32.cont [3/16] (narrow) %v301_v5, 8  ;;  %v330_v30 = vld [vmem:[%s1156_s7 + $0xf8] sm:$0xff]  ;;  %v454_v32 = vld [vmem:[%s1195_s10 + $0x80] sm:$0xff]  ;;  %v455_v34 = vld [vmem:[%s1195_s10 + $0x88] sm:$0xff] }
  0x25   : > { %v314_v31 = vld [vmem:[%s1156_s7 + $0x78] sm:$0xff]  ;;  %v438_v33 = vld [vmem:[%s1195_s10] sm:$0xff]  ;;  %v439_v35 = vld [vmem:[%s1195_s10 + $0x8] sm:$0xff]  ;;  %s962_s7 = scalar_lea.vmem %s961_s6, 256 }
  0x26   : > { %v456_v36 = vld [vmem:[%s1195_s10 + $0x90] sm:$0xff]  ;;  %v457_v38 = vld [vmem:[%s1195_s10 + $0x98] sm:$0xff]  ;;  %v458_v40 = vld [vmem:[%s1195_s10 + $0xa0] sm:$0xff]  ;;  %p964_p2 = scmp.lt.s32.totalorder %s962_s7, %s956_s30 }
  0x27   : > { %366 = vxpose.xlu1.b32.cont [4/16] (narrow) %v318_v6, 8  ;;  %v440_v37 = vld [vmem:[%s1195_s10 + $0x10] sm:$0xff]  ;;  %v441_v39 = vld [vmem:[%s1195_s10 + $0x18] sm:$0xff]  ;;  %v442_v41 = vld [vmem:[%s1195_s10 + $0x20] sm:$0xff] }
  0x28   : > { %334 = vxpose.xlu0.b32.cont [4/16] (narrow) %v302_v7, 8  ;;  %v459_v42 = vld [vmem:[%s1195_s10 + $0xa8] sm:$0xff]  ;;  %v460_v44 = vld [vmem:[%s1195_s10 + $0xb0] sm:$0xff]  ;;  %v461_v46 = vld [vmem:[%s1195_s10 + $0xb8] sm:$0xff]  ;;  %p965_p3 = por %p964_p2, %p963_p1 }
  0x29   : > { %v443_v43 = vld [vmem:[%s1195_s10 + $0x28] sm:$0xff]  ;;  %v444_v45 = vld [vmem:[%s1195_s10 + $0x30] sm:$0xff]  ;;  %v445_v47 = vld [vmem:[%s1195_s10 + $0x38] sm:$0xff] }
  0x2a   : > { %v462_v48 = vld [vmem:[%s1195_s10 + $0xc0] sm:$0xff]  ;;  %v463_v50 = vld [vmem:[%s1195_s10 + $0xc8] sm:$0xff]  ;;  %v464_v52 = vld [vmem:[%s1195_s10 + $0xd0] sm:$0xff]  ;;  %p966_p5 = pnand %p965_p3, %p959_p0 }
  0x2b   : > { %367 = vxpose.xlu1.b32.cont [5/16] (narrow) %v319_v8, 8  ;;  %v446_v49 = vld [vmem:[%s1195_s10 + $0x40] sm:$0xff]  ;;  %v447_v51 = vld [vmem:[%s1195_s10 + $0x48] sm:$0xff]  ;;  %v448_v53 = vld [vmem:[%s1195_s10 + $0x50] sm:$0xff] }
  0x2c   : > { %335 = vxpose.xlu0.b32.cont [5/16] (narrow) %v303_v9, 8  ;;  %v465_v54 = vld [vmem:[%s1195_s10 + $0xd8] sm:$0xff]  ;;  %v466_v56 = vld [vmem:[%s1195_s10 + $0xe0] sm:$0xff]  ;;  %v467_v58 = vld [vmem:[%s1195_s10 + $0xe8] sm:$0xff] }
  0x2d   : > { %v449_v55 = vld [vmem:[%s1195_s10 + $0x58] sm:$0xff]  ;;  %v450_v57 = vld [vmem:[%s1195_s10 + $0x60] sm:$0xff]  ;;  %v451_v59 = vld [vmem:[%s1195_s10 + $0x68] sm:$0xff] }
  0x2e   : > { %v468_v60 = vld [vmem:[%s1195_s10 + $0xf0] sm:$0xff]  ;;  %v469_v62 = vld [vmem:[%s1195_s10 + $0xf8] sm:$0xff] }
  0x2f   : > { %368 = vxpose.xlu1.b32.cont [6/16] (narrow) %v320_v10, 8  ;;  %v452_v61 = vld [vmem:[%s1195_s10 + $0x70] sm:$0xff]  ;;  %v453_v63 = vld [vmem:[%s1195_s10 + $0x78] sm:$0xff] }
  0x30   : > { %336 = vxpose.xlu0.b32.cont [6/16] (narrow) %v304_v11, 8 }
  0x33   : > { %369 = vxpose.xlu1.b32.cont [7/16] (narrow) %v321_v12, 8 }
  0x34   : > { %337 = vxpose.xlu0.b32.cont [7/16] (narrow) %v305_v13, 8 }
  0x37   : > { %370 = vxpose.xlu1.b32.cont [8/16] (narrow) %v322_v14, 8 }
  0x38   : > { %338 = vxpose.xlu0.b32.cont [8/16] (narrow) %v306_v15, 8 }
  0x3b   : > { %371 = vxpose.xlu1.b32.cont [9/16] (narrow) %v323_v16, 8 }
  0x3c   : > { %339 = vxpose.xlu0.b32.cont [9/16] (narrow) %v307_v17, 8 }
  0x3f   : > { %372 = vxpose.xlu1.b32.cont [10/16] (narrow) %v324_v18, 8 }
  0x40   : > { %340 = vxpose.xlu0.b32.cont [10/16] (narrow) %v308_v19, 8 }
  0x43   : > { %373 = vxpose.xlu1.b32.cont [11/16] (narrow) %v325_v20, 8 }
  0x44   : > { %341 = vxpose.xlu0.b32.cont [11/16] (narrow) %v309_v21, 8 }
  0x47   : > { %374 = vxpose.xlu1.b32.cont [12/16] (narrow) %v326_v22, 8 }
  0x48   : > { %342 = vxpose.xlu0.b32.cont [12/16] (narrow) %v310_v23, 8 }
  0x4b   : > { %375 = vxpose.xlu1.b32.cont [13/16] (narrow) %v327_v24, 8 }
  0x4c   : > { %343 = vxpose.xlu0.b32.cont [13/16] (narrow) %v311_v25, 8 }
  0x4f   : > { %376 = vxpose.xlu1.b32.cont [14/16] (narrow) %v328_v26, 8 }
  0x50   : > { %344 = vxpose.xlu0.b32.cont [14/16] (narrow) %v312_v27, 8 }
  0x53   : > { %377 = vxpose.xlu1.b32.cont [15/16] (narrow) %v329_v28, 8 }
  0x54   : > { %345 = vxpose.xlu0.b32.cont [15/16] (narrow) %v313_v29, 8 }
  0x57   : > { %378 = vxpose.xlu1.b32.end [16/16] (narrow) %v330_v30, 8 }
  0x58   : > { %346 = vxpose.xlu0.b32.end [16/16] (narrow) %v314_v31, 8 }
  0x5b   : > { %502 = vxpose.xlu1.b32.start [1/16] (narrow) %v454_v32, 8 }
  0x5c   : > { %470 = vxpose.xlu0.b32.start [1/16] (narrow) %v438_v33, 8 }
  0x5f   : > { %503 = vxpose.xlu1.b32.cont [2/16] (narrow) %v455_v34, 8 }
  0x60   : > { %471 = vxpose.xlu0.b32.cont [2/16] (narrow) %v439_v35, 8 }
  0x63   : > { %504 = vxpose.xlu1.b32.cont [3/16] (narrow) %v456_v36, 8 }
  0x64   : > { %472 = vxpose.xlu0.b32.cont [3/16] (narrow) %v440_v37, 8 }
  0x67   : > { %505 = vxpose.xlu1.b32.cont [4/16] (narrow) %v457_v38, 8 }
  0x68   : > { %473 = vxpose.xlu0.b32.cont [4/16] (narrow) %v441_v39, 8 }
  0x6b   : > { %506 = vxpose.xlu1.b32.cont [5/16] (narrow) %v458_v40, 8 }
  0x6c   : > { %474 = vxpose.xlu0.b32.cont [5/16] (narrow) %v442_v41, 8 }
  0x6f   : > { %507 = vxpose.xlu1.b32.cont [6/16] (narrow) %v459_v42, 8 }
  0x70   : > { %475 = vxpose.xlu0.b32.cont [6/16] (narrow) %v443_v43, 8 }
  0x73   : > { %508 = vxpose.xlu1.b32.cont [7/16] (narrow) %v460_v44, 8 }
  0x74   : > { %476 = vxpose.xlu0.b32.cont [7/16] (narrow) %v444_v45, 8 }
  0x77   : > { %509 = vxpose.xlu1.b32.cont [8/16] (narrow) %v461_v46, 8 }
  0x78   : > { %477 = vxpose.xlu0.b32.cont [8/16] (narrow) %v445_v47, 8 }
  0x7b   : > { %510 = vxpose.xlu1.b32.cont [9/16] (narrow) %v462_v48, 8 }
  0x7c   : > { %478 = vxpose.xlu0.b32.cont [9/16] (narrow) %v446_v49, 8 }
  0x7f   : > { %511 = vxpose.xlu1.b32.cont [10/16] (narrow) %v463_v50, 8 }
  0x80   : > { %479 = vxpose.xlu0.b32.cont [10/16] (narrow) %v447_v51, 8 }
  0x83   : > { %512 = vxpose.xlu1.b32.cont [11/16] (narrow) %v464_v52, 8 }
  0x84   : > { %480 = vxpose.xlu0.b32.cont [11/16] (narrow) %v448_v53, 8 }
  0x87   : > { %513 = vxpose.xlu1.b32.cont [12/16] (narrow) %v465_v54, 8 }
  0x88   : > { %481 = vxpose.xlu0.b32.cont [12/16] (narrow) %v449_v55, 8 }
  0x8b   : > { %514 = vxpose.xlu1.b32.cont [13/16] (narrow) %v466_v56, 8 }
  0x8c   : > { %482 = vxpose.xlu0.b32.cont [13/16] (narrow) %v450_v57, 8 }
  0x8f   : > { %515 = vxpose.xlu1.b32.cont [14/16] (narrow) %v467_v58, 8 }
  0x90   : > { %483 = vxpose.xlu0.b32.cont [14/16] (narrow) %v451_v59, 8 }
  0x93   : > { %516 = vxpose.xlu1.b32.cont [15/16] (narrow) %v468_v60, 8 }
  0x94   : > { %484 = vxpose.xlu0.b32.cont [15/16] (narrow) %v452_v61, 8 }
  0x97   : > { %517 = vxpose.xlu1.b32.end [16/16] (narrow) %v469_v62, 8  ;;  %v379_v0 = vpop.trf.xlu1 }
  0x98   : > { %485 = vxpose.xlu0.b32.end [16/16] (narrow) %v453_v63, 8  ;;  %v347_v1 = vpop.trf.xlu0  ;;  %v401_v2 = vrot.slane %v379_v0, 4 }
  0x99   : > { %v395_v3 = vrot.slane %v347_v1, 4 }
  0x9a   : > { %v402_v4 = vmax.f32 %v379_v0, %v401_v2 }
  0x9b   : > { %v396_v5 = vmax.f32 %v347_v1, %v395_v3 }
  0x9c   : > { %v403_v6 = vrot.slane %v402_v4, 2 }
  0x9d   : > { %v397_v7 = vrot.slane %v396_v5, 2 }
  0x9e   : > { %v404_v8 = vmax.f32 %v402_v4, %v403_v6 }
  0x9f   : > { %v398_v9 = vmax.f32 %v396_v5, %v397_v7 }
  0xa0   : > { %v405_v10 = vrot.slane %v404_v8, 1 }
  0xa1   : > { %v399_v11 = vrot.slane %v398_v9, 1 }
  0xa2   : > { %v406_v12 = vmax.f32 %v404_v8, %v405_v10 }
  0xa3   : > { %v400_v13 = vmax.f32 %v398_v9, %v399_v11 }
  0xa4   : > { %v408_v14 = vsub.f32 %v379_v0, %v406_v12 }
  0xa5   : > { %v407_v15 = vsub.f32 %v347_v1, %v400_v13 }
  0xa6   : > { %v411_v16 = vmul.f32 1.442695, %v408_v14 }
  0xa7   : > { %v409_v17 = vmul.f32 1.442695, %v407_v15 }
  0xa8   : > { %944 = vpow2.f32 %v411_v16 }
  0xa9   : > { %946 = vpow2.f32 %v409_v17 }
  0xb5   : > { %v945_v18 = vpop.eup %944 }
  0xb6   : > { %v947_v19 = vpop.eup %946  ;;  %v419_v20 = vrot.slane %v945_v18, 4 }
  0xb7   : > { %v413_v21 = vrot.slane %v947_v19, 4 }
  0xb8   : > { %v420_v22 = vadd.f32 %v945_v18, %v419_v20 }
  0xb9   : > { %v414_v23 = vadd.f32 %v947_v19, %v413_v21 }
  0xba   : > { %v421_v24 = vrot.slane %v420_v22, 2 }
  0xbb   : > { %v415_v25 = vrot.slane %v414_v23, 2 }
  0xbc   : > { %v422_v26 = vadd.f32 %v421_v24, %v420_v22 }
  0xbd   : > { %v416_v27 = vadd.f32 %v415_v25, %v414_v23 }
  0xbe   : > { %v423_v28 = vrot.slane %v422_v26, 1 }
  0xbf   : > { %v417_v29 = vrot.slane %v416_v27, 1 }
  0xc0   : > { %v424_v30 = vadd.f32 %v423_v28, %v422_v26 }
  0xc1   : > { %v418_v31 = vadd.f32 %v417_v29, %v416_v27 }
  0xc2   : > { %948 = vrcp.f32 %v424_v30 }
  0xc3   : > { %950 = vrcp.f32 %v418_v31 }
  0xcf   : > { %v949_v32 = vpop.eup %948 }
  0xd0   : > { %v951_v33 = vpop.eup %950  ;;  %v428_v34 = vmul.f32 %v949_v32, %v945_v18 }
  0xd1   : > { %v426_v35 = vmul.f32 %v951_v33, %v947_v19 }
  0xd3   : > { %v881_v36 = vpack.c.bf16 %v428_v34, %v426_v35 }
  0xd5   : > { %437 = vst [vmem:[%s263_s14] sm:$0xff] %v881_v36 }
  0xd6   : > { %969 = shalt.err (!%p966_p5)
}
  0xd7   : > { %s970_s8 = scalar_lea.hbm %s695_s26, 128  ;;  %s974_s12 = scalar_lea.hbm %s1316_s3, 256 }
  0xd8   : > { %p971_p6 = scmp.ne.s32.totalorder %s695_s26, %s970_s8  ;;  %p975_p10 = scmp.lt.s32.totalorder %s695_s26, %s1316_s3 }
  0xd9   : > { %p976_p11 = scmp.lt.s32.totalorder %s974_s12, %s970_s8 }
  0xda   : > { %p972_p7 = pnand %p971_p6, %p1131_p4 }
  0xdb   : > { %p977_p12 = por %p976_p11, %p975_p10 }
  0xdc   : > { %p973_p9 = pneg %p972_p7 }
  0xde   : > { %p978_p13 = pnand %p977_p12, %p973_p9 }
  0xe0   : > { %981 = shalt.err (!%p978_p13)
}
  0xe1   : > { %884 = dma.vmem_to_hbm [thread:$0]  (%p1131_p4), %s698_s21, 128, %s695_s26, %s676_s29   ;;  %v518_v37 = vpop.trf.xlu1  ;;  %v486_v38 = vpop.trf.xlu0  ;;  %v538_v41 = vlaneseq  ;;  %v534_v46 = vld [vmem:[%s1315_s2] sm:$0xff]  ;;  %vm652_vm0 = vcmask 1040384   ;;  %vm655_vm1 = vcmask 1041408   ;;  %vm658_vm2 = vcmask 1042432  }
  0xe2   : > { %v573_v39 = vmul.f32 0.2, %v518_v37  ;;  %v572_v40 = vmul.f32 0.2, %v486_v38  ;;  %v536_v51 = vmul.f32 0.1, %v518_v37 }
  0xe3   : > { %v539_v44 = vshrl.u32 %v538_v41, 7  ;;  %v535_v55 = vmul.f32 0.1, %v486_v38  ;;  %s864_s21 = sshll.u32 %s1230_s11, 4  ;;  %vm661_vm3 = vcmask 1043456   ;;  %vm664_vm4 = vcmask 1044480  }
  0xe4   : > { %v576_v42 = vmul.f32 1.442695, %v573_v39  ;;  %v574_v43 = vmul.f32 1.442695, %v572_v40  ;;  %vm667_vm5 = vcmask 1045504   ;;  %s883_s26 = sshll.u32 %s1054_s18, 8 }
  0xe5   : > { %v544_v45 = vsub.s32 6, %v539_v44  ;;  %v561_v47 = vsub.s32 7, %v539_v44  ;;  %v540_v48 = vsub.s32 2, %v539_v44  ;;  %v557_v49 = vsub.s32 3, %v539_v44  ;;  %s270_s29 = scalar_lea.vmem [#allocation4], %s864_s21  ;;  %s1266_s7 = scalar_lea.hbm %s1317_s4, %s883_s26 }
  0xe6   : > { %952 = vpow2.f32 %v576_v42  ;;  %v600_v4 = vsub.s32 0, %v539_v44  ;;  %v604_v5 = vsub.s32 4, %v539_v44  ;;  %v611_v6 = vsub.s32 1, %v539_v44  ;;  %s713_s30 = sshll.u32 %s270_s29, 4  ;;  %s681_s18 = scalar_lea.sflag [#allocation5], %s1230_s11  ;;  %s1268_s30 = int_to_ptr.vmem [resolvable:$true] %s713_s30 }
  0xe7   : > { %954 = vpow2.f32 %v574_v43  ;;  %v545_v50 = vrot.slane %v534_v46, %v544_v45  ;;  %v562_v52 = vrot.slane %v534_v46, %v561_v47  ;;  %v541_v53 = vrot.slane %v534_v46, %v540_v48  ;;  %s982_s8 = scalar_lea.vmem %s1268_s30, 256  ;;  %s1065_s9 = smov [#allocation4]  }
  0xe8   : > { %v558_v54 = vrot.slane %v534_v46, %v557_v49  ;;  %v615_v8 = vsub.s32 5, %v539_v44  ;;  %vm670_vm6 = vcmask 1046528   ;;  %p983_p0 = scmp.ne.s32.totalorder %s1268_s30, %s982_s8  ;;  %s986_s10 = sshll.u32 %s1065_s9, 4  ;;  %s987_s10 = int_to_ptr.vmem [resolvable:$false] %s986_s10 }
  0xe9   : > { %v549_v58 = vmul.f32 %v545_v50, %v536_v51  ;;  %v566_v59 = vmul.f32 %v562_v52, %v536_v51  ;;  %v548_v60 = vmul.f32 %v541_v53, %v535_v55  ;;  %s988_s12 = scalar_lea.vmem %s987_s10, 512  ;;  %p989_p3 = scmp.lt.s32.totalorder %s1268_s30, %s987_s10 }
  0xea   : > { %v565_v61 = vmul.f32 %v558_v54, %v535_v55  ;;  %p984_p1 = pnand %p983_p0, %p1131_p4  ;;  %p990_p5 = scmp.lt.s32.totalorder %s988_s12, %s982_s8 }
  0xeb   : > { %v552_v0 = vcombine.low %v548_v60, %v549_v58 }
  0xec   : > { %v569_v1 = vcombine.low %v565_v61, %v566_v59  ;;  %p985_p2 = pneg %p984_p1  ;;  %p991_p6 = por %p990_p5, %p989_p3 }
  0xed   : > { %v554_v9 = vadd.f32 %v552_v0, %v534_v46 }
  0xee   : > { %v571_v10 = vadd.f32 %v569_v1, %v534_v46  ;;  %p992_p7 = pnand %p991_p6, %p985_p2 }
  0xf3   : > { %v953_v56 = vpop.eup %952 }
  0xf4   : > { %v955_v57 = vpop.eup %954 }
  0xf5   : > { %v580_v62 = vcombine.low %v955_v57, %v953_v56 }
  0xf7   : > { %v582_v63 = vmul.f32 %v580_v62, %v534_v46 }
  0xf9   : > { %v583_v2 = vmul.f32 0.5, %v582_v63  ;;  %v870_v7 = vrot.slane %v582_v63, 9 }
  0xfb   : > { %v585_v3 = vrot.slane %v583_v2, 6  ;;  %v596_v16 = vmul.f32 %v870_v7, %v582_v63 }
  0xfd   : > { %v586_v11 = vrot.slane %v585_v3, 4  ;;  %v645_v27 = vrot.slane %v596_v16, %v540_v48  ;;  %v649_v28 = vrot.slane %v596_v16, %v544_v45 }
  0xff   : > { %v588_v12 = vsub.f32 %v554_v9, %v586_v11  ;;  %v589_v13 = vsub.f32 %v571_v10, %v586_v11  ;;  %v590_v14 = vadd.f32 %v586_v11, %v554_v9  ;;  %v591_v15 = vadd.f32 %v586_v11, %v571_v10 }
 0x101   : > { %v601_v17 = vrot.slane %v588_v12, %v600_v4  ;;  %v605_v18 = vrot.slane %v588_v12, %v604_v5  ;;  %v612_v19 = vrot.slane %v589_v13, %v611_v6  ;;  %v616_v20 = vrot.slane %v589_v13, %v615_v8 }
 0x102   : > { %v623_v21 = vrot.slane %v590_v14, %v600_v4  ;;  %v627_v22 = vrot.slane %v590_v14, %v604_v5  ;;  %v634_v23 = vrot.slane %v591_v15, %v611_v6  ;;  %v638_v24 = vrot.slane %v591_v15, %v615_v8 }
 0x103   : > { %v653_v25 = vsel %vm652_vm0, %v601_v17, %v612_v19  ;;  %v654_v26 = vsel %vm652_vm0, %v605_v18, %v616_v20 }
 0x104   : > { %v656_v29 = vsel %vm655_vm1, %v653_v25, %v623_v21  ;;  %v657_v30 = vsel %vm655_vm1, %v654_v26, %v627_v22 }
 0x105   : > { %v659_v31 = vsel %vm658_vm2, %v656_v29, %v634_v23  ;;  %v660_v32 = vsel %vm658_vm2, %v657_v30, %v638_v24 }
 0x106   : > { %v662_v33 = vsel %vm661_vm3, %v659_v31, %v645_v27  ;;  %v663_v34 = vsel %vm661_vm3, %v660_v32, %v649_v28 }
 0x107   : > { %v665_v35 = vsel %vm664_vm4, %v662_v33, 0.0  ;;  %v666_v36 = vsel %vm664_vm4, %v663_v34, 0.0 }
 0x108   : > { %v668_v37 = vsel %vm667_vm5, %v665_v35, 0.0  ;;  %v669_v38 = vsel %vm667_vm5, %v666_v36, 0.0 }
 0x109   : > { %v671_v39 = vsel %vm670_vm6, %v668_v37, 0.0  ;;  %v672_v40 = vsel %vm670_vm6, %v669_v38, 0.0 }
 0x10a   : > { %673 = vst [vmem:[%s270_s29] sm:$0xff] %v671_v39  ;;  %674 = vst [vmem:[%s270_s29 + $0x8] sm:$0xff] %v672_v40 }
 0x10b   : > { %995 = shalt.err (!%p992_p7)
}
 0x10c   : > { %s996_s13 = scalar_lea.hbm %s1266_s7, 256  ;;  %s1000_s22 = scalar_lea.hbm %s1317_s4, 512 }
 0x10d   : > { %p997_p9 = scmp.ne.s32.totalorder %s1266_s7, %s996_s13  ;;  %p1001_p12 = scmp.lt.s32.totalorder %s1266_s7, %s1317_s4 }
 0x10e   : > { %p1002_p13 = scmp.lt.s32.totalorder %s1000_s22, %s996_s13 }
 0x10f   : > { %p998_p10 = pnand %p997_p9, %p1131_p4 }
 0x110   : > { %p1003_p0 = por %p1002_p13, %p1001_p12 }
 0x111   : > { %p999_p11 = pneg %p998_p10 }
 0x113   : > { %p1004_p1 = pnand %p1003_p0, %p999_p11 }
 0x115   : > { %1007 = shalt.err (!%p1004_p1)
}
 0x116   : > { %885 = dma.vmem_to_hbm [thread:$0]  (%p1131_p4), %s1268_s30, 256, %s1266_s7, %s681_s18  }
 0x117 PF: > { %p895_p2 = scmp.ge.s32.totalorder %s1062_s20, 2  ;;  %s725_s26 = sand.u32 1, %s1042_s15  }
 0x118   : > { %s726_s29 = scalar_lea.sflag [#allocation3], %s725_s26 }
 0x119   : > { %p889_p3 = pnand %p895_p2, %p1138_p8 }
 0x11b   : > { %p890_p5 = pneg %p889_p3 }
 0x11d   : > { %1033 = dma.done.wait (%p890_p5), %s726_s29, 128  }
 0x11e   : > { %1035 = vsyncadd (%p890_p5), %s726_s29, 4294967168  ;;  %s735_s5 = scalar_lea.sflag [#allocation5], %s725_s26 }
 0x11f   : > { %1037 = dma.done.wait (%p890_p5), %s735_s5, 256  }
 0x120   : > { %1039 = vsyncadd (%p890_p5), %s735_s5, 4294967040  ;;  %s21_s20 = sadd.s32 1, %s1062_s20   ;;  %s1320_s15 = smov %s1046_s16 }
 0x121   : > { %p18_p6 = scmp.ge.s32.totalorder %s21_s20, 4   ;;  %s1321_s16 = smov %s1050_s17 }
 0x122   : > { %s1322_s17 = smov %s1144_s28  ;;  %s1323_s18 = smov %s1058_s19 }
 0x123   : > { %s1324_s19 = smov %s1326_s23  ;;  %20 = sbr.rel (!%p18_p6) target bundleno = 6 (0x6), region = 90 }
 0x128   :  { %740 = vsyncpa [#allocation3], 1 }
 0x129   :  { %742 = vsyncpa [#allocation3 + $0x1], 1 }
 0x12a   :  { %743 = vsyncpa [#allocation5], 1 }
 0x12b   :  { %745 = vsyncpa [#allocation5 + $0x1], 1 }

</bundles_post_ra>
